<compile_context>
chip_gen: v6e
topology: v6e:2x2x1
jax: 0.10.0
libtpu: 0.0.40
codegen_flags: <defaults>
</compile_context>

<pallas_src>
import functools

import jax
import jax.numpy as jnp
from jax.experimental import pallas as pl
from jax.experimental.pallas import tpu as pltpu


CONV_PAD = 128     # conv output channels zero-padded to a full lane width
FEATURES = 256     # backbone feature width (matches fc3/fc4 input)
HEAD_N = 128       # fused head output lanes: [fc3(64) | fc4(1) | zero pad]


# ------------------------------------------------------------------ kernel ---
def model_kernel(patches_ref, conv_w_ref, conv_b_ref,
                 proj_w_ref, proj_b_ref,
                 head_w_ref, head_b_ref,
                 out_ref, *, tb, hw):
    # --- synthetic backbone: conv(3x3) as matmul over im2col patches --------
    # [TB*HW, Cin*9] (bf16) x [Cin*9, 128] (bf16) -> f32
    conv = jnp.dot(patches_ref[...], conv_w_ref[...],
                   preferred_element_type=jnp.float32)
    conv = jnp.maximum(conv + conv_b_ref[...], 0.0)          # [TB*HW, 128]

    # --- global average pool FIRST (exact: pool commutes with the linear) ---
    # TODO(synk): if profiling shows the XLU saturated here, replace with an
    # unrolled 8-step strided add tree on the VPU.
    pooled = jnp.sum(conv.reshape(tb, hw, conv.shape[-1]), axis=1) * (1.0 / hw)

    # --- projection (eval-mode BN already folded into proj_w / proj_b) ------
    feat = jnp.dot(pooled.astype(proj_w_ref.dtype), proj_w_ref[...],
                   preferred_element_type=jnp.float32) + proj_b_ref[...]  # [TB, 256]

    # ReLU; Dropout = identity (eval mode)
    x = jnp.maximum(feat, 0.0)

    # --- fused heads: [fc3 | fc4 | zero-pad] in one [256, 128] matmul -------
    head = jnp.dot(x.astype(head_w_ref.dtype), head_w_ref[...],
                   preferred_element_type=jnp.float32) + head_b_ref[...]  # [TB, 128]

    lane = jax.lax.broadcasted_iota(jnp.int32, head.shape, 1)
    is_policy = lane < 64                                     # lanes 0..63 -> policy

    # masked softmax over the 64 policy lanes (exact normalization)
    masked = jnp.where(is_policy, head, -jnp.inf)
    m = jnp.max(masked, axis=1, keepdims=True)
    e = jnp.exp(masked - m)                                   # exp(-inf) = 0 on pad lanes
    denom = jnp.sum(e, axis=1, keepdims=True)
    policy = e / denom

    # value = tanh(fc4) lives in lane 64; remaining lanes are don't-care.
    out_ref[...] = jnp.where(is_policy, policy, jnp.tanh(head)).astype(out_ref.dtype)


# ------------------------------------------------------------------ wrapper --
def im2col_3x3_same(x):
    """x: [B, C, H, W] (NCHW) -> patches [B*H*W, C*9] bf16, Cin-major, taps minor."""
    B, C, H, W = x.shape
    xp = jnp.pad(x, ((0, 0), (0, 0), (1, 1), (1, 1)))
    taps = []
    for dh in range(3):
        for dw in range(3):
            taps.append(xp[:, :, dh:dh + H, dw:dw + W])
    p = jnp.stack(taps, axis=2)                 # [B, C, 9, H, W]
    p = p.reshape(B, C * 9, H * W)              # [B, C*9, HW]
    p = p.transpose(0, 2, 1)                    # [B, HW, C*9]
    return p.reshape(B * H * W, C * 9).astype(jnp.bfloat16)


def _pick_batch_tile(batch, max_tb=128):
    """Largest batch tile <= max_tb that divides B (multiple of 8 when tiling)."""
    if batch <= max_tb:
        return batch
    for tb in range(max_tb, 7, -8):
        if batch % tb == 0:
            return tb
    return batch


@jax.jit
def model_forward(x, params):
    """x: [B, 2, H, W] float32 (NCHW). Returns (policy [B, 64], value [B, 1])."""
    B, Cin, H, W = x.shape
    HW = H * W
    K9 = Cin * 9
    TB = _pick_batch_tile(B)

    patches = im2col_3x3_same(x)                # [B*HW, Cin*9] bf16; fuses under jit

    resident = lambda shape: pl.BlockSpec(shape, lambda i: (0, 0))
    args = (patches, params["conv_w"], params["conv_b"],
            params["proj_w"], params["proj_b"],
            params["head_w"], params["head_b"])

    out = pl.pallas_call(
        functools.partial(model_kernel, tb=TB, hw=HW),
        out_shape=jax.ShapeDtypeStruct((B, HEAD_N), jnp.float32),
        grid=(B // TB,),
        in_specs=[
            pl.BlockSpec((TB * HW, K9), lambda i: (i, 0)),       # patches (tiled)
            resident((K9, CONV_PAD)),                            # conv_w
            resident((1, CONV_PAD)),                             # conv_b
            resident((CONV_PAD, FEATURES)),                      # proj_w (BN folded)
            resident((1, FEATURES)),                             # proj_b
            resident((FEATURES, HEAD_N)),                        # head_w (fc3|fc4)
            resident((1, HEAD_N)),                               # head_b
        ],
        out_specs=pl.BlockSpec((TB, HEAD_N), lambda i: (i, 0)),
        compiler_params=pltpu.CompilerParams(
            dimension_semantics=("parallel",)),
    )(*args)

    policy = out[:, :64]
    value = out[:, 64:65]
    return policy, value


def init_params(key, cin=2, conv_ch=32, features=FEATURES):
    ks = jax.random.split(key, 8)
    s = 0.1
    return {
        # synthetic backbone
        "conv_w": s * jax.random.normal(ks[0], (cin * 9, conv_ch), jnp.float32),
        "conv_b": s * jax.random.normal(ks[1], (1, conv_ch), jnp.float32),
        "proj_w": s * jax.random.normal(ks[2], (conv_ch, features), jnp.float32),
        "proj_b": s * jax.random.normal(ks[3], (1, features), jnp.float32),
        # BatchNorm1d(features) -- eval-mode running stats
        "bn_gamma": jnp.ones((1, features), jnp.float32),
        "bn_beta": jnp.zeros((1, features), jnp.float32),
        "bn_mean": jnp.zeros((1, features), jnp.float32),
        "bn_var": jnp.ones((1, features), jnp.float32),
        # heads
        "fc3_w": s * jax.random.normal(ks[4], (features, 64), jnp.float32),
        "fc3_b": s * jax.random.normal(ks[5], (1, 64), jnp.float32),
        "fc4_w": s * jax.random.normal(ks[6], (features, 1), jnp.float32),
        "fc4_b": s * jax.random.normal(ks[7], (1, 1), jnp.float32),
    }


def prepare_params(p, eps=1e-5):
    """Host-side prep: fold eval-mode BN into proj, pad to lane-dense widths,
    fuse fc3/fc4 into one head, cast matmul weights to bf16 (biases stay f32)."""
    conv_ch = p["conv_w"].shape[1]
    features = p["proj_w"].shape[1]

    # fold BN (running stats) into the projection
    scale = p["bn_gamma"] * jax.lax.rsqrt(p["bn_var"] + eps)            # [1, F]
    proj_w = p["proj_w"] * scale                                        # W' = W*s
    proj_b = (p["proj_b"] - p["bn_mean"]) * scale + p["bn_beta"]        # b' folded

    # lane-dense zero padding: conv out channels -> 128, proj rows -> 128
    conv_w = jnp.pad(p["conv_w"], ((0, 0), (0, CONV_PAD - conv_ch)))
    conv_b = jnp.pad(p["conv_b"], ((0, 0), (0, CONV_PAD - conv_ch)))
    proj_w = jnp.pad(proj_w, ((0, CONV_PAD - conv_ch), (0, 0)))

    # fused head: [fc3 | fc4 | zero pad] -> [F, 128]
    pad_n = HEAD_N - 64 - 1
    head_w = jnp.concatenate(
        [p["fc3_w"], p["fc4_w"], jnp.zeros((features, pad_n), jnp.float32)], axis=1)
    head_b = jnp.concatenate(
        [p["fc3_b"], p["fc4_b"], jnp.zeros((1, pad_n), jnp.float32)], axis=1)

    return {
        "conv_w": conv_w.astype(jnp.bfloat16),
        "conv_b": conv_b.astype(jnp.float32),
        "proj_w": proj_w.astype(jnp.bfloat16),
        "proj_b": proj_b.astype(jnp.float32),
        "head_w": head_w.astype(jnp.bfloat16),
        "head_b": head_b.astype(jnp.float32),
    }


if __name__ == "__main__":
    key = jax.random.PRNGKey(0)
    k_x, k_p = jax.random.split(key)

    # Othello board: batch=2, 2 input channels, 8x8 spatial (NCHW like PyTorch)
    x = jax.random.normal(k_x, (2, 2, 8, 8), jnp.float32)
    params = prepare_params(init_params(k_p))

    policy, value = model_forward(x, params)
    jax.block_until_ready((policy, value))

    assert policy.shape == (2, 64) and value.shape == (2, 1)
    # exact softmax normalization; tanh in [-1, 1]
    assert jnp.allclose(jnp.sum(policy, axis=1), 1.0, atol=1e-5)
    assert jnp.all(jnp.abs(value) <= 1.0)
    print("KERNEL_OK")
</pallas_src>

<mosaic_0001>
module attributes {stable_mosaic.version = 11 : i64} {
  func.func @model_kernel(%arg0: i32, %arg1: memref<128x18xbf16, #tpu.memory_space<vmem>>, %arg2: memref<18x128xbf16, #tpu.memory_space<vmem>>, %arg3: memref<1x128xf32, #tpu.memory_space<vmem>>, %arg4: memref<128x256xbf16, #tpu.memory_space<vmem>>, %arg5: memref<1x256xf32, #tpu.memory_space<vmem>>, %arg6: memref<256x128xbf16, #tpu.memory_space<vmem>>, %arg7: memref<1x128xf32, #tpu.memory_space<vmem>>, %arg8: memref<2x128xf32, #tpu.memory_space<vmem>>) attributes {dimension_semantics = [#tpu.dimension_semantics<parallel>], iteration_bounds = array<i64: 1>, scalar_prefetch = 0 : i64, scratch_operands = 0 : i64, tpu.core_type = #tpu.core_type<tc>, window_params = [{transform_indices = @transform_0, window_bounds = array<i64: 128, 18>}, {pipeline_mode = #tpu.pipeline_mode<synchronous>, transform_indices = @transform_1, window_bounds = array<i64: 18, 128>}, {pipeline_mode = #tpu.pipeline_mode<synchronous>, transform_indices = @transform_2, window_bounds = array<i64: 1, 128>}, {pipeline_mode = #tpu.pipeline_mode<synchronous>, transform_indices = @transform_3, window_bounds = array<i64: 128, 256>}, {pipeline_mode = #tpu.pipeline_mode<synchronous>, transform_indices = @transform_4, window_bounds = array<i64: 1, 256>}, {pipeline_mode = #tpu.pipeline_mode<synchronous>, transform_indices = @transform_5, window_bounds = array<i64: 256, 128>}, {pipeline_mode = #tpu.pipeline_mode<synchronous>, transform_indices = @transform_6, window_bounds = array<i64: 1, 128>}, {transform_indices = @transform_7, window_bounds = array<i64: 2, 128>}]} {
    %c0 = arith.constant 0 : index
    %c0_0 = arith.constant 0 : index
    %0 = vector.load %arg1[%c0, %c0_0] : memref<128x18xbf16, #tpu.memory_space<vmem>>, vector<128x18xbf16>
    %c0_1 = arith.constant 0 : index
    %c0_2 = arith.constant 0 : index
    %1 = vector.load %arg2[%c0_1, %c0_2] : memref<18x128xbf16, #tpu.memory_space<vmem>>, vector<18x128xbf16>
    %cst = arith.constant dense<0.000000e+00> : vector<128x128xf32>
    %2 = tpu.matmul %0, %1, %cst {dimension_numbers = #tpu.dot_dimension_numbers<[1], [0], [0], [1], [0, 0, 1, 1], [], []>} : vector<128x18xbf16>, vector<18x128xbf16>, vector<128x128xf32> -> vector<128x128xf32>
    %c0_3 = arith.constant 0 : index
    %c0_4 = arith.constant 0 : index
    %3 = vector.load %arg3[%c0_3, %c0_4] : memref<1x128xf32, #tpu.memory_space<vmem>>, vector<1x128xf32>
    %4 = vector.broadcast %3 : vector<1x128xf32> to vector<128x128xf32>
    %5 = arith.addf %2, %4 : vector<128x128xf32>
    %cst_5 = arith.constant 0.000000e+00 : f32
    %6 = vector.broadcast %cst_5 : f32 to vector<128x128xf32>
    %7 = arith.maximumf %5, %6 : vector<128x128xf32>
    %8 = vector.shape_cast %7 : vector<128x128xf32> to vector<2x64x128xf32>
    %cst_6 = arith.constant dense<0.000000e+00> : vector<2x128xf32>
    %9 = vector.multi_reduction <add>, %8, %cst_6 [1] : vector<2x64x128xf32> to vector<2x128xf32>
    %cst_7 = arith.constant 1.562500e-02 : f32
    %10 = vector.broadcast %cst_7 : f32 to vector<2x128xf32>
    %11 = arith.mulf %9, %10 : vector<2x128xf32>
    %12 = arith.truncf %11 : vector<2x128xf32> to vector<2x128xbf16>
    %c0_8 = arith.constant 0 : index
    %c0_9 = arith.constant 0 : index
    %13 = vector.load %arg4[%c0_8, %c0_9] : memref<128x256xbf16, #tpu.memory_space<vmem>>, vector<128x256xbf16>
    %cst_10 = arith.constant dense<0.000000e+00> : vector<2x256xf32>
    %14 = tpu.matmul %12, %13, %cst_10 {dimension_numbers = #tpu.dot_dimension_numbers<[1], [0], [0], [1], [0, 0, 1, 1], [], []>} : vector<2x128xbf16>, vector<128x256xbf16>, vector<2x256xf32> -> vector<2x256xf32>
    %c0_11 = arith.constant 0 : index
    %c0_12 = arith.constant 0 : index
    %15 = vector.load %arg5[%c0_11, %c0_12] : memref<1x256xf32, #tpu.memory_space<vmem>>, vector<1x256xf32>
    %16 = vector.broadcast %15 : vector<1x256xf32> to vector<2x256xf32>
    %17 = arith.addf %14, %16 : vector<2x256xf32>
    %cst_13 = arith.constant 0.000000e+00 : f32
    %18 = vector.broadcast %cst_13 : f32 to vector<2x256xf32>
    %19 = arith.maximumf %17, %18 : vector<2x256xf32>
    %20 = arith.truncf %19 : vector<2x256xf32> to vector<2x256xbf16>
    %c0_14 = arith.constant 0 : index
    %c0_15 = arith.constant 0 : index
    %21 = vector.load %arg6[%c0_14, %c0_15] : memref<256x128xbf16, #tpu.memory_space<vmem>>, vector<256x128xbf16>
    %cst_16 = arith.constant dense<0.000000e+00> : vector<2x128xf32>
    %22 = tpu.matmul %20, %21, %cst_16 {dimension_numbers = #tpu.dot_dimension_numbers<[1], [0], [0], [1], [0, 0, 1, 1], [], []>} : vector<2x256xbf16>, vector<256x128xbf16>, vector<2x128xf32> -> vector<2x128xf32>
    %c0_17 = arith.constant 0 : index
    %c0_18 = arith.constant 0 : index
    %23 = vector.load %arg7[%c0_17, %c0_18] : memref<1x128xf32, #tpu.memory_space<vmem>>, vector<1x128xf32>
    %24 = vector.broadcast %23 : vector<1x128xf32> to vector<2x128xf32>
    %25 = arith.addf %22, %24 : vector<2x128xf32>
    %26 = tpu.iota {dimensions = array<i32: 1>} : vector<2x128xi32>
    %c64_i32 = arith.constant 64 : i32
    %27 = vector.broadcast %c64_i32 : i32 to vector<2x128xi32>
    %28 = arith.cmpi slt, %26, %27 : vector<2x128xi32>
    %cst_19 = arith.constant 0xFF800000 : f32
    %29 = vector.broadcast %cst_19 : f32 to vector<2x128xf32>
    %30 = arith.select %28, %25, %29 : vector<2x128xi1>, vector<2x128xf32>
    %cst_20 = arith.constant dense<0xFF800000> : vector<2xf32>
    %31 = vector.multi_reduction <maximumf>, %30, %cst_20 [1] : vector<2x128xf32> to vector<2xf32>
    %32 = vector.shape_cast %31 : vector<2xf32> to vector<2x1xf32>
    %33 = vector.broadcast %32 : vector<2x1xf32> to vector<2x128xf32>
    %34 = arith.subf %30, %33 : vector<2x128xf32>
    %35 = math.exp %34 : vector<2x128xf32>
    %cst_21 = arith.constant dense<0.000000e+00> : vector<2xf32>
    %36 = vector.multi_reduction <add>, %35, %cst_21 [1] : vector<2x128xf32> to vector<2xf32>
    %37 = vector.shape_cast %36 : vector<2xf32> to vector<2x1xf32>
    %38 = vector.broadcast %37 : vector<2x1xf32> to vector<2x128xf32>
    %39 = arith.divf %35, %38 : vector<2x128xf32>
    %40 = math.tanh %25 : vector<2x128xf32>
    %41 = arith.select %28, %39, %40 : vector<2x128xi1>, vector<2x128xf32>
    %c0_22 = arith.constant 0 : index
    %c0_23 = arith.constant 0 : index
    %42 = vector.load %arg8[%c0_22, %c0_23] : memref<2x128xf32, #tpu.memory_space<vmem>>, vector<2x128xf32>
    tpu.vector_store %arg8[%c0_22, %c0_23], %41 {strides = array<i32>} : memref<2x128xf32, #tpu.memory_space<vmem>>, vector<2x128xf32>,
    return
  }
  func.func @transform_0(%arg0: i32) -> (i32, i32) {
    %c0_i32 = arith.constant 0 : i32
    %c0_i32_0 = arith.constant 0 : i32
    return %arg0, %c0_i32 : i32, i32
  }
  func.func @transform_1(%arg0: i32) -> (i32, i32) {
    %c0_i32 = arith.constant 0 : i32
    %c0_i32_0 = arith.constant 0 : i32
    %c0_i32_1 = arith.constant 0 : i32
    return %c0_i32, %c0_i32_0 : i32, i32
  }
  func.func @transform_2(%arg0: i32) -> (i32, i32) {
    %c0_i32 = arith.constant 0 : i32
    %c0_i32_0 = arith.constant 0 : i32
    %c0_i32_1 = arith.constant 0 : i32
    return %c0_i32, %c0_i32_0 : i32, i32
  }
  func.func @transform_3(%arg0: i32) -> (i32, i32) {
    %c0_i32 = arith.constant 0 : i32
    %c0_i32_0 = arith.constant 0 : i32
    %c0_i32_1 = arith.constant 0 : i32
    return %c0_i32, %c0_i32_0 : i32, i32
  }
  func.func @transform_4(%arg0: i32) -> (i32, i32) {
    %c0_i32 = arith.constant 0 : i32
    %c0_i32_0 = arith.constant 0 : i32
    %c0_i32_1 = arith.constant 0 : i32
    return %c0_i32, %c0_i32_0 : i32, i32
  }
  func.func @transform_5(%arg0: i32) -> (i32, i32) {
    %c0_i32 = arith.constant 0 : i32
    %c0_i32_0 = arith.constant 0 : i32
    %c0_i32_1 = arith.constant 0 : i32
    return %c0_i32, %c0_i32_0 : i32, i32
  }
  func.func @transform_6(%arg0: i32) -> (i32, i32) {
    %c0_i32 = arith.constant 0 : i32
    %c0_i32_0 = arith.constant 0 : i32
    %c0_i32_1 = arith.constant 0 : i32
    return %c0_i32, %c0_i32_0 : i32, i32
  }
  func.func @transform_7(%arg0: i32) -> (i32, i32) {
    %c0_i32 = arith.constant 0 : i32
    %c0_i32_0 = arith.constant 0 : i32
    return %arg0, %c0_i32 : i32, i32
  }
}

</mosaic_0001>

<bundles_post_ra>
// kernel: model_forward.1
= control target key start
LH: loop header
LB: loop body
LE: loop exit
PB: predicated region body
PF: predicated region fallthrough
CT: control target
= control target key end

     0   :  { %vm127_vm0 = vcmask 1040384   ;;  %vm102_vm1 = vcmask 146432   ;;  %v795_v24 = vmov 0   ;;  %vm306_vm2 = vcmask 1041409   ;;  %s984_s1 = inlined_call_operand.vmem [shape: bf16[18,128], index: 1, kind: input, shape index: {}]   ;;  %s985_s0 = inlined_call_operand.vmem [shape: bf16[128,18], index: 0, kind: input, shape index: {}]   ;;  %s986_s3 = inlined_call_operand.vmem [shape: bf16[128,256], index: 3, kind: input, shape index: {}]   ;;  %s987_s5 = inlined_call_operand.vmem [shape: bf16[256,128], index: 5, kind: input, shape index: {}]   ;;  %s988_s2 = inlined_call_operand.vmem [shape: f32[1,128], index: 2, kind: input, shape index: {}]   ;;  %s989_s4 = inlined_call_operand.vmem [shape: f32[1,256], index: 4, kind: input, shape index: {}]   ;;  %s990_s6 = inlined_call_operand.vmem [shape: f32[1,128], index: 6, kind: input, shape index: {}]   ;;  %s991_s7 = inlined_call_operand.vmem [shape: f32[2,128], index: 7, kind: output, shape index: {}]  }
   0x1   :  { %v739_v0 = vld [vmem:[%s984_s1 + $0x8] ss:$0 sps:$4 sm:$0x11]   ;;  %v740_v1 = vld [vmem:[%s984_s1] sm:$0xff]   ;;  %v743_v5 = vld [vmem:[%s985_s0 + $0x10] sm:$0xff]   ;;  %422 = vmatprep.mubr.bf16.mxu1 %v795_v24  ;;  %vm614_vm4 = vcmask 1041408  }
   0x2   :  { %737 = vmatprep.subr.msk.bf16.mxu0 %vm127_vm0, %v739_v0  ;;  %v129_v2 = vsel %vm127_vm0, %v739_v0, 0  ;;  %v741_v3 = vld [vmem:[%s985_s0] sm:$0xff]   ;;  %v742_v4 = vld [vmem:[%s985_s0 + $0x8] sm:$0xff]   ;;  %v744_v6 = vld [vmem:[%s985_s0 + $0x18] sm:$0xff]  }
   0x3   :  { %718 = vmatpush3.bf16.msra.mxu0 %v129_v2  ;;  %721 = vmatprep.mubr.msk.bf16.mxu0 %vm102_vm1, %v741_v3  ;;  %v745_v7 = vld [vmem:[%s985_s0 + $0x20] sm:$0xff]   ;;  %v746_v8 = vld [vmem:[%s985_s0 + $0x28] sm:$0xff]   ;;  %v747_v9 = vld [vmem:[%s985_s0 + $0x30] sm:$0xff]  }
   0x4   :  { %719 = vmatprep.subr.bf16.mxu0 %v740_v1  ;;  %v748_v10 = vld [vmem:[%s985_s0 + $0x38] sm:$0xff]   ;;  %v752_v13 = vld [vmem:[%s986_s3 + $0x64] ss:$8 sps:$4 sm:$0xff]   ;;  %v754_v14 = vld [vmem:[%s986_s3 + $0x60] ss:$8 sps:$4 sm:$0xff]  }
   0x5   :  { %v749_v11 = vld [vmem:[%s986_s3 + $0x74] ss:$8 sps:$4 sm:$0xff]   ;;  %v751_v12 = vld [vmem:[%s986_s3 + $0x70] ss:$8 sps:$4 sm:$0xff]   ;;  %v758_v17 = vld [vmem:[%s986_s3 + $0x44] ss:$8 sps:$4 sm:$0xff]  }
   0x6   :  { %390 = vmatprep.subr.bf16.mxu1 %v749_v11  ;;  %v755_v15 = vld [vmem:[%s986_s3 + $0x54] ss:$8 sps:$4 sm:$0xff]   ;;  %v757_v16 = vld [vmem:[%s986_s3 + $0x50] ss:$8 sps:$4 sm:$0xff]   ;;  %v760_v18 = vld [vmem:[%s986_s3 + $0x40] ss:$8 sps:$4 sm:$0xff]  }
   0x7   :  { %720 = vmatpush3.bf16.msra.mxu0 %v740_v1  ;;  %391 = vmatpush1.bf16.msra.mxu1 %v751_v12  ;;  %v761_v19 = vld [vmem:[%s986_s3 + $0x34] ss:$8 sps:$4 sm:$0xff]   ;;  %v763_v20 = vld [vmem:[%s986_s3 + $0x30] ss:$8 sps:$4 sm:$0xff]   ;;  %v764_v21 = vld [vmem:[%s986_s3 + $0x24] ss:$8 sps:$4 sm:$0xff]  }
   0x8   :  { %392 = vmatprep.subr.bf16.mxu1 %v752_v13  ;;  %v766_v22 = vld [vmem:[%s986_s3 + $0x20] ss:$8 sps:$4 sm:$0xff]   ;;  %v767_v23 = vld [vmem:[%s986_s3 + $0x14] ss:$8 sps:$4 sm:$0xff]   ;;  %v769_v25 = vld [vmem:[%s986_s3 + $0x10] ss:$8 sps:$4 sm:$0xff]  }
   0x9   :  { %v770_v26 = vld [vmem:[%s986_s3 + $0x4] ss:$8 sps:$4 sm:$0xff]   ;;  %v772_v27 = vld [vmem:[%s986_s3] ss:$8 sps:$4 sm:$0xff]   ;;  %v773_v28 = vld [vmem:[%s987_s5 + $0x78] sm:$0xff]  }
   0xa   :  { %722 = vmatmul.mubr.msk.bf16.vlgmr.msra.gmra.mxu0 %vm102_vm1, %v742_v4  ;;  %v774_v29 = vld [vmem:[%s987_s5 + $0x38] sm:$0xff]   ;;  %695 = vmatprep.subr.bf16.mxu0 %v773_v28  ;;  %v775_v30 = vld [vmem:[%s987_s5 + $0x70] sm:$0xff]   ;;  %v777_v32 = vld [vmem:[%s987_s5 + $0x68] sm:$0xff]  }
   0xb   :  { %725 = vmatprep.mubr.msk.bf16.mxu0 %vm102_vm1, %v743_v5  ;;  %393 = vmatpush1.bf16.msra.mxu1 %v754_v14  ;;  %v776_v31 = vld [vmem:[%s987_s5 + $0x30] sm:$0xff]   ;;  %v778_v33 = vld [vmem:[%s987_s5 + $0x28] sm:$0xff]   ;;  %v779_v34 = vld [vmem:[%s987_s5 + $0x60] sm:$0xff]  }
   0xc   :  { %394 = vmatprep.subr.bf16.mxu1 %v755_v15  ;;  %696 = vmatpush3.bf16.msra.mxu0 %v774_v29  ;;  %v780_v35 = vld [vmem:[%s987_s5 + $0x20] sm:$0xff]   ;;  %v781_v36 = vld [vmem:[%s987_s5 + $0x58] sm:$0xff]   ;;  %v783_v38 = vld [vmem:[%s987_s5 + $0x50] sm:$0xff]  }
   0xd   :  { %697 = vmatprep.subr.bf16.mxu0 %v775_v30  ;;  %v782_v37 = vld [vmem:[%s987_s5 + $0x18] sm:$0xff]   ;;  %v784_v39 = vld [vmem:[%s987_s5 + $0x10] sm:$0xff]   ;;  %v633_v42 = vld [vmem:[%s988_s2] ss:$0 sm:$0xff] }
   0xf   :  { %395 = vmatpush1.bf16.msra.mxu1 %v757_v16 }
  0x10   :  { %396 = vmatprep.subr.bf16.mxu1 %v758_v17  ;;  %698 = vmatpush3.bf16.msra.mxu0 %v776_v31 }
  0x11   :  { %699 = vmatprep.subr.bf16.mxu0 %v777_v32 }
  0x12   :  { %726 = vmatmul.mubr.msk.bf16.gmra.mxu0 %vm102_vm1, %v744_v6 }
  0x13   :  { %729 = vmatprep.mubr.msk.bf16.mxu0 %vm102_vm1, %v745_v7  ;;  %397 = vmatpush1.bf16.msra.mxu1 %v760_v18 }
  0x14   :  { %398 = vmatprep.subr.bf16.mxu1 %v761_v19  ;;  %700 = vmatpush3.bf16.msra.mxu0 %v778_v33 }
  0x15   :  { %701 = vmatprep.subr.bf16.mxu0 %v779_v34 }
  0x17   :  { %399 = vmatpush1.bf16.msra.mxu1 %v763_v20 }
  0x18   :  { %400 = vmatprep.subr.bf16.mxu1 %v764_v21  ;;  %702 = vmatpush3.bf16.msra.mxu0 %v780_v35 }
  0x19   :  { %703 = vmatprep.subr.bf16.mxu0 %v781_v36 }
  0x1a   :  { %730 = vmatmul.mubr.msk.bf16.gmra.mxu0 %vm102_vm1, %v746_v8 }
  0x1b   :  { %733 = vmatprep.mubr.msk.bf16.mxu0 %vm102_vm1, %v747_v9  ;;  %401 = vmatpush1.bf16.msra.mxu1 %v766_v22 }
  0x1c   :  { %402 = vmatprep.subr.bf16.mxu1 %v767_v23  ;;  %704 = vmatpush3.bf16.msra.mxu0 %v782_v37 }
  0x1d   :  { %705 = vmatprep.subr.bf16.mxu0 %v783_v38 }
  0x1f   :  { %403 = vmatpush1.bf16.msra.mxu1 %v769_v25 }
  0x20   :  { %404 = vmatprep.subr.bf16.mxu1 %v770_v26  ;;  %706 = vmatpush3.bf16.msra.mxu0 %v784_v39 }
  0x22   :  { %734 = vmatmul.mubr.msk.bf16.gmra.mxu0 %vm102_vm1, %v748_v10 }
  0x23   :  { %405 = vmatpush1.bf16.msra.mxu1 %v772_v27 }
  0xca   :  { %v723_v40 = vpop.f32.mrf.mxu0 }
  0xcb   :  { %v174_v46 = vadd.f32 %v723_v40, %v633_v42 }
  0xcc   :  { %v165_v41 = vpop.f32.mrf.mxu0 }
  0xcd   :  { %v166_v44 = vadd.f32 %v633_v42, %v165_v41  ;;  %v230_v53 = vmax.f32 %v174_v46, 0.0 }
  0xce   :  { %v724_v43 = vpop.f32.mrf.mxu0 }
  0xcf   :  { %v228_v49 = vmax.f32 %v166_v44, 0.0  ;;  %v177_v50 = vadd.f32 %v724_v43, %v633_v42 }
  0xd0   :  { %v168_v45 = vpop.f32.mrf.mxu0 }
  0xd1   :  { %v169_v47 = vadd.f32 %v633_v42, %v168_v45  ;;  %v231_v57 = vmax.f32 %v177_v50, 0.0 }
  0xd2   :  { %v727_v48 = vpop.f32.mrf.mxu0 }
  0xd3   :  { %v229_v51 = vmax.f32 %v169_v47, 0.0  ;;  %v190_v60 = vadd.f32 %v727_v48, %v633_v42 }
  0xd4   :  { %v181_v52 = vpop.f32.mrf.mxu0 }
  0xd5   :  { %v244_v54 = vadd.f32 %v229_v51, %v228_v49  ;;  %v182_v55 = vadd.f32 %v633_v42, %v181_v52  ;;  %v234_v5 = vmax.f32 %v190_v60, 0.0  ;;  %v786_v60 = vld [vmem:[%s987_s5 + $0x8] sm:$0xff]  }
  0xd6   :  { %v728_v56 = vpop.f32.mrf.mxu0 }
  0xd7   :  { %v245_v58 = vadd.f32 %v244_v54, %v230_v53  ;;  %v232_v61 = vmax.f32 %v182_v55, 0.0  ;;  %v193_v2 = vadd.f32 %v728_v56, %v633_v42 }
  0xd8   :  { %v184_v59 = vpop.f32.mrf.mxu0 }
  0xd9   :  { %v246_v62 = vadd.f32 %v245_v58, %v231_v57  ;;  %v185_v63 = vadd.f32 %v633_v42, %v184_v59  ;;  %v235_v8 = vmax.f32 %v193_v2, 0.0  ;;  %v785_v59 = vld [vmem:[%s987_s5 + $0x48] sm:$0xff]   ;;  %v290_v2 = vld [vmem:[%s989_s4] sm:$0x3] }
  0xda   :  { %v731_v0 = vpop.f32.mrf.mxu0  ;;  %707 = vmatprep.subr.bf16.mxu0 %v785_v59 }
  0xdb   :  { %v247_v1 = vadd.f32 %v246_v62, %v232_v61  ;;  %v233_v3 = vmax.f32 %v185_v63, 0.0  ;;  %v206_v13 = vadd.f32 %v731_v0, %v633_v42  ;;  %708 = vmatpush3.bf16.msra.mxu0 %v786_v60  ;;  %v787_v61 = vld [vmem:[%s987_s5 + $0x40] sm:$0xff]   ;;  %v292_v63 = vlaneseq }
  0xdc   :  { %v197_v4 = vpop.f32.mrf.mxu0  ;;  %v788_v62 = vld [vmem:[%s987_s5] sm:$0xff]   ;;  %709 = vmatprep.subr.bf16.mxu0 %v787_v61 }
  0xdd   :  { %v248_v6 = vadd.f32 %v247_v1, %v233_v3  ;;  %v198_v10 = vadd.f32 %v633_v42, %v197_v4  ;;  %v238_v21 = vmax.f32 %v206_v13, 0.0  ;;  %v293_v0 = vshrl.u32 %v292_v63, 7 }
  0xde   :  { %v732_v7 = vpop.f32.mrf.mxu0 }
  0xdf   :  { %v249_v9 = vadd.f32 %v248_v6, %v234_v5  ;;  %v236_v17 = vmax.f32 %v198_v10, 0.0  ;;  %v209_v18 = vadd.f32 %v732_v7, %v633_v42  ;;  %710 = vmatpush3.bf16.msra.mxu0 %v788_v62  ;;  %v294_v1 = vsub.s32 0, %v293_v0 }
  0xe0   :  { %v200_v11 = vpop.f32.mrf.mxu0  ;;  %v298_v3 = vsub.s32 1, %v293_v0 }
  0xe1   :  { %v250_v12 = vadd.f32 %v249_v9, %v235_v8  ;;  %v201_v14 = vadd.f32 %v633_v42, %v200_v11  ;;  %v239_v26 = vmax.f32 %v209_v18, 0.0  ;;  %v295_v4 = vrot.slane %v290_v2, %v294_v1  ;;  %v668_v18 = vld [vmem:[%s990_s6] ss:$0 sm:$0xff] }
  0xe2   :  { %v735_v15 = vpop.f32.mrf.mxu0  ;;  %v299_v5 = vrot.slane %v290_v2, %v298_v3 }
  0xe3   :  { %v251_v16 = vrot.slane %v250_v12, 4  ;;  %v237_v19 = vmax.f32 %v201_v14, 0.0  ;;  %v222_v29 = vadd.f32 %v735_v15, %v633_v42 }
  0xe4   :  { %v213_v20 = vpop.f32.mrf.mxu0 }
  0xe5   :  { %v257_v22 = vadd.f32 %v237_v19, %v236_v17  ;;  %v214_v23 = vadd.f32 %v633_v42, %v213_v20  ;;  %v252_v25 = vadd.f32 %v251_v16, %v250_v12  ;;  %v242_v37 = vmax.f32 %v222_v29, 0.0 }
  0xe6   :  { %v736_v24 = vpop.f32.mrf.mxu0  ;;  %v611_v17 = vand.u32 127, %v292_v63 }
  0xe7   :  { %v258_v27 = vadd.f32 %v257_v22, %v238_v21  ;;  %v240_v30 = vmax.f32 %v214_v23, 0.0  ;;  %v253_v33 = vrot.slane %v252_v25, 2  ;;  %v225_v35 = vadd.f32 %v736_v24, %v633_v42 }
  0xe8   :  { %v216_v28 = vpop.f32.mrf.mxu0  ;;  %vm612_vm3 = vcmp.lt.s32.totalorder %v611_v17, 64 }
  0xe9   :  { %v259_v31 = vadd.f32 %v258_v27, %v239_v26  ;;  %v217_v32 = vadd.f32 %v633_v42, %v216_v28  ;;  %v254_v39 = vadd.f32 %v253_v33, %v252_v25  ;;  %v243_v40 = vmax.f32 %v225_v35, 0.0 }
  0xeb   :  { %v260_v34 = vadd.f32 %v259_v31, %v240_v30  ;;  %v241_v36 = vmax.f32 %v217_v32, 0.0  ;;  %v255_v45 = vrot.slane %v254_v39, 1 }
  0xed   :  { %v261_v38 = vadd.f32 %v260_v34, %v241_v36  ;;  %v256_v48 = vadd.f32 %v255_v45, %v254_v39 }
  0xef   :  { %v262_v41 = vadd.f32 %v261_v38, %v242_v37  ;;  %v270_v51 = vmul.f32 0.015625, %v256_v48 }
  0xf1   :  { %v263_v43 = vadd.f32 %v262_v41, %v243_v40  ;;  %v272_v54 = vpack.c.bf16 %v270_v51, %v270_v51 }
  0xf3   :  { %v264_v44 = vrot.slane %v263_v43, 4  ;;  %v304_v42 = vunpack.c.l.b16 %v272_v54 }
  0xf5   :  { %v265_v46 = vadd.f32 %v264_v44, %v263_v43 }
  0xf7   :  { %v266_v47 = vrot.slane %v265_v46, 2 }
  0xf9   :  { %v267_v49 = vadd.f32 %v266_v47, %v265_v46 }
  0xfb   :  { %v268_v50 = vrot.slane %v267_v49, 1 }
  0xfd   :  { %v269_v52 = vadd.f32 %v268_v50, %v267_v49 }
  0xff   :  { %v271_v53 = vmul.f32 0.015625, %v269_v52 }
 0x101   :  { %v273_v55 = vpack.c.bf16 %v271_v53, %v271_v53 }
 0x103   :  { %v305_v56 = vunpack.c.l.b16 %v273_v55 }
 0x105   :  { %v307_v57 = vsel %vm306_vm2, %v305_v56, %v304_v42 }
 0x106   :  { %v308_v58 = vpack.c.b16 %v307_v57, %v307_v57 }
 0x108   :  { %423 = vmatmul.mubr.bf16.vlgmr.msra.gmra.mxu1 %v308_v58 }
 0x1c8   :  { %v424_v6 = vpop.f32.mrf.mxu1 }
 0x1c9   :  { %v425_v7 = vadd.f32 %v424_v6, %v295_v4 }
 0x1ca   :  { %v426_v8 = vpop.f32.mrf.mxu1 }
 0x1cb   :  { %v427_v9 = vadd.f32 %v426_v8, %v299_v5  ;;  %v431_v10 = vmax.f32 %v425_v7, 0.0 }
 0x1cc   :  { %v428_v11 = vpop.f32.mrf.mxu1 }
 0x1cd   :  { %v432_v12 = vmax.f32 %v427_v9, 0.0  ;;  %v433_v15 = vpack.c.bf16 %v431_v10, %v431_v10 }
 0x1ce   :  { %v429_v13 = vpop.f32.mrf.mxu1 }
 0x1cf   :  { %v434_v14 = vpack.c.bf16 %v432_v12, %v432_v12 }
 0x1d1   :  { %602 = vmatprep.mubr.bf16.mxu0 %v434_v14 }
 0x1d2   :  { %603 = vmatmul.mubr.bf16.vlgmr.msra.gmra.mxu0 %v433_v15 }
 0x292   :  { %v711_v16 = vpop.f32.mrf.mxu0 }
 0x294   :  { %v712_v19 = vpop.f32.mrf.mxu0 }
 0x295   :  { %v713_v20 = vadd.f32 %v712_v19, %v711_v16 }
 0x296   :  { %v714_v21 = vpop.f32.mrf.mxu0 }
 0x297   :  { %v605_v22 = vadd.f32 %v713_v20, %v668_v18 }
 0x298   :  { %v715_v23 = vpop.f32.mrf.mxu0 }
 0x299   :  { %v613_v24 = vsel %vm612_vm3, %v605_v22, -inf }
 0x29a   :  { %v615_v25 = vsel %vm614_vm4, %v613_v24, -inf }
 0x29b   :  { %616 = vmax.xlane.f32.xlu0 %v615_v25 }
 0x324   :  { %v617_v26 = vpop.xlane.xlu0 %616 }
 0x325   :  { %v618_v27 = vsub.f32 %v613_v24, %v617_v26 }
 0x327   :  { %v619_v28 = vmul.f32 1.442695, %v618_v27 }
 0x329   :  { %789 = vpow2.f32 %v619_v28 }
 0x336   :  { %v790_v29 = vpop.eup %789 }
 0x337   :  { %v621_v30 = vsel %vm614_vm4, %v790_v29, 0.0 }
 0x338   :  { %622 = vadd.xlane.f32.xlu0 %v621_v30 }
 0x3c1   :  { %v623_v31 = vpop.xlane.xlu0 %622 }
 0x3c2   :  { %791 = vrcp.f32 %v623_v31 }
 0x3c3   :  { %793 = vtanh.f32 %v605_v22 }
 0x3cf   :  { %v792_v32 = vpop.eup %791 }
 0x3d0   :  { %v625_v33 = vmul.f32 %v792_v32, %v790_v29  ;;  %v794_v34 = vpop.eup %793 }
 0x3d2   :  { %v627_v35 = vsel %vm612_vm3, %v625_v33, %v794_v34 }
 0x3d3   :  { %628 = vst [vmem:[%s991_s7] sm:$0x3] %v627_v35 }

</bundles_post_ra>
